<compile_context>
chip_gen: v6e
topology: v6e:2x2x1
jax: 0.10.0
libtpu: 0.0.40
codegen_flags: <defaults>
</compile_context>

<pallas_src>
import functools

import jax
import jax.numpy as jnp
from jax.experimental import pallas as pl
from jax.experimental.pallas import tpu as pltpu

HIDDEN = 256
LANE = 128
TILE_B_MAX = 512  # multiple of 256 (v6e/v7x MXU) and 128 (v5e MXU); tiny vs VMEM


def _round_up(x: int, m: int) -> int:
    return ((x + m - 1) // m) * m


def postproc_kernel(z_ref, w1_ref, b1_ref, a1_ref,
                    w2_ref, b2_ref, a2_ref,
                    w3_ref, b3_ref, o_ref):
    # z tile is f32 (tile_b, d_embed); weights bf16; biases f32.
    z = z_ref[...].astype(jnp.bfloat16)
    a1 = a1_ref[0, 0]
    a2 = a2_ref[0, 0]

    # Layer 1: Linear(d_embed, 256) + (Dropout = identity) + PReLU  [f32 acc]
    h = jnp.dot(z, w1_ref[...], preferred_element_type=jnp.float32) + b1_ref[...]
    h = jnp.where(h > 0, h, a1 * h)

    # Layer 2: Linear(256, 256) + (Dropout = identity) + PReLU
    h = jnp.dot(h.astype(jnp.bfloat16), w2_ref[...],
                preferred_element_type=jnp.float32) + b2_ref[...]
    h = jnp.where(h > 0, h, a2 * h)

    # Layer 3: Linear(256, num_params_padded) + Sigmoid (lane-dense store)
    y = jnp.dot(h.astype(jnp.bfloat16), w3_ref[...],
                preferred_element_type=jnp.float32) + b3_ref[...]
    o_ref[...] = jax.nn.sigmoid(y).astype(o_ref.dtype)


def prepare_params(raw_params):
    """One-time prep: cast matmul weights to bf16, pad the output dim of the
    last layer to a multiple of 128 lanes, keep biases/alphas in f32."""
    w1, b1, a1, w2, b2, a2, w3, b3 = raw_params
    num_params = w3.shape[1]
    n_pad = _round_up(num_params, LANE)
    pad = n_pad - num_params
    w3p = jnp.pad(w3, ((0, 0), (0, pad)))
    b3p = jnp.pad(b3, ((0, 0), (0, pad)))
    prepared = (
        w1.astype(jnp.bfloat16), b1.astype(jnp.float32),
        a1.reshape(1, 1).astype(jnp.float32),
        w2.astype(jnp.bfloat16), b2.astype(jnp.float32),
        a2.reshape(1, 1).astype(jnp.float32),
        w3p.astype(jnp.bfloat16), b3p.astype(jnp.float32),
    )
    return prepared, num_params


@functools.partial(jax.jit, static_argnames=("num_params",))
def post_processor(z, prepared, num_params):
    """z: (B, d_embed) f32. prepared/num_params: from prepare_params."""
    w1, b1, a1, w2, b2, a2, w3p, b3p = prepared
    B, d_embed = z.shape
    n_pad = w3p.shape[1]

    # Batch tiling: big tiles for pipelining; tiny batches stay near-unpadded.
    tile_b = min(TILE_B_MAX, _round_up(B, 8))
    b_pad = _round_up(B, tile_b)
    zp = z if b_pad == B else jnp.pad(z, ((0, b_pad - B), (0, 0)))
    grid = (b_pad // tile_b,)

    const2d = lambda i: (0, 0)
    smem_spec = pl.BlockSpec(memory_space=pltpu.MemorySpace.SMEM)

    flops = 2 * b_pad * (d_embed * HIDDEN + HIDDEN * HIDDEN + HIDDEN * n_pad)
    bytes_accessed = (
        zp.size * zp.dtype.itemsize + b_pad * n_pad * 4
        + sum(int(p.size) * p.dtype.itemsize
              for p in (w1, b1, w2, b2, w3p, b3p)))
    cost = pl.CostEstimate(flops=flops,
                           transcendentals=b_pad * n_pad,
                           bytes_accessed=bytes_accessed)

    out = pl.pallas_call(
        postproc_kernel,
        out_shape=jax.ShapeDtypeStruct((b_pad, n_pad), jnp.float32),
        grid=grid,
        in_specs=[
            pl.BlockSpec((tile_b, d_embed), lambda i: (i, 0)),   # z tile
            pl.BlockSpec((d_embed, HIDDEN), const2d),            # w1 (resident)
            pl.BlockSpec((1, HIDDEN), const2d),                  # b1
            smem_spec,                                           # alpha1
            pl.BlockSpec((HIDDEN, HIDDEN), const2d),             # w2
            pl.BlockSpec((1, HIDDEN), const2d),                  # b2
            smem_spec,                                           # alpha2
            pl.BlockSpec((HIDDEN, n_pad), const2d),              # w3 (padded)
            pl.BlockSpec((1, n_pad), const2d),                   # b3 (padded)
        ],
        out_specs=pl.BlockSpec((tile_b, n_pad), lambda i: (i, 0)),
        compiler_params=pltpu.CompilerParams(
            dimension_semantics=("parallel",)),
        cost_estimate=cost,
    )(zp, w1, b1, a1, w2, b2, a2, w3p, b3p)

    # Drop batch padding and the lane-padding columns (padded sigmoid cols
    # would be sigmoid(0)=0.5 — never exposed downstream).
    return out[:B, :num_params]


def init_params(key, d_embed, num_params, hidden=HIDDEN):
    """Deterministic init mimicking PyTorch defaults:
    Linear: U(-1/sqrt(fan_in), 1/sqrt(fan_in)); PReLU: alpha = 0.25 (scalar).
    Weights stored transposed (in_features, out_features)."""
    ks = jax.random.split(key, 6)

    def linear(kw, kb, fan_in, fan_out):
        bound = 1.0 / jnp.sqrt(jnp.float32(fan_in))
        w = jax.random.uniform(kw, (fan_in, fan_out), jnp.float32, -bound, bound)
        b = jax.random.uniform(kb, (1, fan_out), jnp.float32, -bound, bound)
        return w, b

    w1, b1 = linear(ks[0], ks[1], d_embed, hidden)
    w2, b2 = linear(ks[2], ks[3], hidden, hidden)
    w3, b3 = linear(ks[4], ks[5], hidden, num_params)
    a1 = jnp.full((1, 1), 0.25, jnp.float32)
    a2 = jnp.full((1, 1), 0.25, jnp.float32)
    return (w1, b1, a1, w2, b2, a2, w3, b3)


def post_processor_ref(z, raw_params):
    """Pure-JAX reference with the SAME numerics as the kernel:
    bf16 matmul operands, f32 accumulation, f32 elementwise."""
    w1, b1, a1, w2, b2, a2, w3, b3 = raw_params
    bf = jnp.bfloat16
    h = jnp.dot(z.astype(bf), w1.astype(bf),
                preferred_element_type=jnp.float32) + b1
    h = jnp.where(h > 0, h, a1[0, 0] * h)
    h = jnp.dot(h.astype(bf), w2.astype(bf),
                preferred_element_type=jnp.float32) + b2
    h = jnp.where(h > 0, h, a2[0, 0] * h)
    y = jnp.dot(h.astype(bf), w3.astype(bf),
                preferred_element_type=jnp.float32) + b3
    return jax.nn.sigmoid(y)


def post_processor_ref_f32(z, raw_params):
    """Full-precision f32 reference (matches PyTorch eval-mode forward)."""
    w1, b1, a1, w2, b2, a2, w3, b3 = raw_params
    h = z @ w1 + b1
    h = jnp.where(h > 0, h, a1[0, 0] * h)
    h = h @ w2 + b2
    h = jnp.where(h > 0, h, a2[0, 0] * h)
    return jax.nn.sigmoid(h @ w3 + b3)


if __name__ == "__main__":
    B, d_embed, num_params = 8, 32, 8

    key = jax.random.PRNGKey(0)
    k_z, k_p = jax.random.split(key)
    z = jax.random.normal(k_z, (B, d_embed), jnp.float32)
    raw_params = init_params(k_p, d_embed, num_params)
    prepared, n_out = prepare_params(raw_params)

    out = post_processor(z, prepared, n_out)
    out = jax.block_until_ready(out)

    assert out.shape == (B, num_params)
    # Matches the bf16-operand / f32-accumulate reference tightly.
    ref = post_processor_ref(z, raw_params)
    assert jnp.allclose(out, ref, atol=1e-4, rtol=1e-4)
    # Stays close to the full-f32 PyTorch-equivalent forward (sigmoid in [0,1]).
    ref32 = post_processor_ref_f32(z, raw_params)
    assert jnp.allclose(out, ref32, atol=5e-2, rtol=5e-2)

    print("KERNEL_OK")
</pallas_src>

<mosaic_0001>
module attributes {stable_mosaic.version = 11 : i64} {
  func.func @postproc_kernel(%arg0: i32, %arg1: memref<8x32xf32, #tpu.memory_space<vmem>>, %arg2: memref<32x256xbf16, #tpu.memory_space<vmem>>, %arg3: memref<1x256xf32, #tpu.memory_space<vmem>>, %arg4: memref<1x1xf32, #tpu.memory_space<smem>>, %arg5: memref<256x256xbf16, #tpu.memory_space<vmem>>, %arg6: memref<1x256xf32, #tpu.memory_space<vmem>>, %arg7: memref<1x1xf32, #tpu.memory_space<smem>>, %arg8: memref<256x128xbf16, #tpu.memory_space<vmem>>, %arg9: memref<1x128xf32, #tpu.memory_space<vmem>>, %arg10: memref<8x128xf32, #tpu.memory_space<vmem>>) attributes {dimension_semantics = [#tpu.dimension_semantics<parallel>], iteration_bounds = array<i64: 1>, scalar_prefetch = 0 : i64, scratch_operands = 0 : i64, tpu.core_type = #tpu.core_type<tc>, window_params = [{transform_indices = @transform_0, window_bounds = array<i64: 8, 32>}, {pipeline_mode = #tpu.pipeline_mode<synchronous>, transform_indices = @transform_1, window_bounds = array<i64: 32, 256>}, {pipeline_mode = #tpu.pipeline_mode<synchronous>, transform_indices = @transform_2, window_bounds = array<i64: 1, 256>}, {transform_indices = @transform_3, window_bounds = array<i64: 1, 1>}, {pipeline_mode = #tpu.pipeline_mode<synchronous>, transform_indices = @transform_4, window_bounds = array<i64: 256, 256>}, {pipeline_mode = #tpu.pipeline_mode<synchronous>, transform_indices = @transform_5, window_bounds = array<i64: 1, 256>}, {transform_indices = @transform_6, window_bounds = array<i64: 1, 1>}, {pipeline_mode = #tpu.pipeline_mode<synchronous>, transform_indices = @transform_7, window_bounds = array<i64: 256, 128>}, {pipeline_mode = #tpu.pipeline_mode<synchronous>, transform_indices = @transform_8, window_bounds = array<i64: 1, 128>}, {transform_indices = @transform_9, window_bounds = array<i64: 8, 128>}]} {
    %c0 = arith.constant 0 : index
    %c0_0 = arith.constant 0 : index
    %0 = vector.load %arg1[%c0, %c0_0] : memref<8x32xf32, #tpu.memory_space<vmem>>, vector<8x32xf32>
    %1 = arith.truncf %0 : vector<8x32xf32> to vector<8x32xbf16>
    %c0_1 = arith.constant 0 : index
    %c0_2 = arith.constant 0 : index
    %2 = memref.load %arg4[%c0_1, %c0_2] : memref<1x1xf32, #tpu.memory_space<smem>>
    %c0_3 = arith.constant 0 : index
    %c0_4 = arith.constant 0 : index
    %3 = memref.load %arg7[%c0_3, %c0_4] : memref<1x1xf32, #tpu.memory_space<smem>>
    %c0_5 = arith.constant 0 : index
    %c0_6 = arith.constant 0 : index
    %4 = vector.load %arg2[%c0_5, %c0_6] : memref<32x256xbf16, #tpu.memory_space<vmem>>, vector<32x256xbf16>
    %cst = arith.constant dense<0.000000e+00> : vector<8x256xf32>
    %5 = tpu.matmul %1, %4, %cst {dimension_numbers = #tpu.dot_dimension_numbers<[1], [0], [0], [1], [0, 0, 1, 1], [], []>} : vector<8x32xbf16>, vector<32x256xbf16>, vector<8x256xf32> -> vector<8x256xf32>
    %c0_7 = arith.constant 0 : index
    %c0_8 = arith.constant 0 : index
    %6 = vector.load %arg3[%c0_7, %c0_8] : memref<1x256xf32, #tpu.memory_space<vmem>>, vector<1x256xf32>
    %7 = vector.broadcast %6 : vector<1x256xf32> to vector<8x256xf32>
    %8 = arith.addf %5, %7 : vector<8x256xf32>
    %cst_9 = arith.constant 0.000000e+00 : f32
    %9 = vector.broadcast %cst_9 : f32 to vector<8x256xf32>
    %10 = arith.cmpf ogt, %8, %9 : vector<8x256xf32>
    %11 = vector.broadcast %2 : f32 to vector<8x256xf32>
    %12 = arith.mulf %11, %8 : vector<8x256xf32>
    %13 = arith.select %10, %8, %12 : vector<8x256xi1>, vector<8x256xf32>
    %14 = arith.truncf %13 : vector<8x256xf32> to vector<8x256xbf16>
    %c0_10 = arith.constant 0 : index
    %c0_11 = arith.constant 0 : index
    %15 = vector.load %arg5[%c0_10, %c0_11] : memref<256x256xbf16, #tpu.memory_space<vmem>>, vector<256x256xbf16>
    %cst_12 = arith.constant dense<0.000000e+00> : vector<8x256xf32>
    %16 = tpu.matmul %14, %15, %cst_12 {dimension_numbers = #tpu.dot_dimension_numbers<[1], [0], [0], [1], [0, 0, 1, 1], [], []>} : vector<8x256xbf16>, vector<256x256xbf16>, vector<8x256xf32> -> vector<8x256xf32>
    %c0_13 = arith.constant 0 : index
    %c0_14 = arith.constant 0 : index
    %17 = vector.load %arg6[%c0_13, %c0_14] : memref<1x256xf32, #tpu.memory_space<vmem>>, vector<1x256xf32>
    %18 = vector.broadcast %17 : vector<1x256xf32> to vector<8x256xf32>
    %19 = arith.addf %16, %18 : vector<8x256xf32>
    %cst_15 = arith.constant 0.000000e+00 : f32
    %20 = vector.broadcast %cst_15 : f32 to vector<8x256xf32>
    %21 = arith.cmpf ogt, %19, %20 : vector<8x256xf32>
    %22 = vector.broadcast %3 : f32 to vector<8x256xf32>
    %23 = arith.mulf %22, %19 : vector<8x256xf32>
    %24 = arith.select %21, %19, %23 : vector<8x256xi1>, vector<8x256xf32>
    %25 = arith.truncf %24 : vector<8x256xf32> to vector<8x256xbf16>
    %c0_16 = arith.constant 0 : index
    %c0_17 = arith.constant 0 : index
    %26 = vector.load %arg8[%c0_16, %c0_17] : memref<256x128xbf16, #tpu.memory_space<vmem>>, vector<256x128xbf16>
    %cst_18 = arith.constant dense<0.000000e+00> : vector<8x128xf32>
    %27 = tpu.matmul %25, %26, %cst_18 {dimension_numbers = #tpu.dot_dimension_numbers<[1], [0], [0], [1], [0, 0, 1, 1], [], []>} : vector<8x256xbf16>, vector<256x128xbf16>, vector<8x128xf32> -> vector<8x128xf32>
    %c0_19 = arith.constant 0 : index
    %c0_20 = arith.constant 0 : index
    %28 = vector.load %arg9[%c0_19, %c0_20] : memref<1x128xf32, #tpu.memory_space<vmem>>, vector<1x128xf32>
    %29 = vector.broadcast %28 : vector<1x128xf32> to vector<8x128xf32>
    %30 = arith.addf %27, %29 : vector<8x128xf32>
    %31 = arith.negf %30 : vector<8x128xf32>
    %32 = math.exp %31 : vector<8x128xf32>
    %cst_21 = arith.constant 1.000000e+00 : f32
    %33 = vector.broadcast %cst_21 : f32 to vector<8x128xf32>
    %34 = arith.addf %33, %32 : vector<8x128xf32>
    %35 = arith.divf %33, %34 : vector<8x128xf32>
    %c0_22 = arith.constant 0 : index
    %c0_23 = arith.constant 0 : index
    %36 = vector.load %arg10[%c0_22, %c0_23] : memref<8x128xf32, #tpu.memory_space<vmem>>, vector<8x128xf32>
    tpu.vector_store %arg10[%c0_22, %c0_23], %35 {strides = array<i32>} : memref<8x128xf32, #tpu.memory_space<vmem>>, vector<8x128xf32>,
    return
  }
  func.func @transform_0(%arg0: i32) -> (i32, i32) {
    %c0_i32 = arith.constant 0 : i32
    %c0_i32_0 = arith.constant 0 : i32
    return %arg0, %c0_i32 : i32, i32
  }
  func.func @transform_1(%arg0: i32) -> (i32, i32) {
    %c0_i32 = arith.constant 0 : i32
    %c0_i32_0 = arith.constant 0 : i32
    %c0_i32_1 = arith.constant 0 : i32
    return %c0_i32, %c0_i32_0 : i32, i32
  }
  func.func @transform_2(%arg0: i32) -> (i32, i32) {
    %c0_i32 = arith.constant 0 : i32
    %c0_i32_0 = arith.constant 0 : i32
    %c0_i32_1 = arith.constant 0 : i32
    return %c0_i32, %c0_i32_0 : i32, i32
  }
  func.func @transform_3(%arg0: i32) -> (i32, i32) {
    %c0_i32 = arith.constant 0 : i32
    %c0_i32_0 = arith.constant 0 : i32
    %c0_i32_1 = arith.constant 0 : i32
    return %c0_i32, %c0_i32_0 : i32, i32
  }
  func.func @transform_4(%arg0: i32) -> (i32, i32) {
    %c0_i32 = arith.constant 0 : i32
    %c0_i32_0 = arith.constant 0 : i32
    %c0_i32_1 = arith.constant 0 : i32
    return %c0_i32, %c0_i32_0 : i32, i32
  }
  func.func @transform_5(%arg0: i32) -> (i32, i32) {
    %c0_i32 = arith.constant 0 : i32
    %c0_i32_0 = arith.constant 0 : i32
    %c0_i32_1 = arith.constant 0 : i32
    return %c0_i32, %c0_i32_0 : i32, i32
  }
  func.func @transform_6(%arg0: i32) -> (i32, i32) {
    %c0_i32 = arith.constant 0 : i32
    %c0_i32_0 = arith.constant 0 : i32
    %c0_i32_1 = arith.constant 0 : i32
    return %c0_i32, %c0_i32_0 : i32, i32
  }
  func.func @transform_7(%arg0: i32) -> (i32, i32) {
    %c0_i32 = arith.constant 0 : i32
    %c0_i32_0 = arith.constant 0 : i32
    %c0_i32_1 = arith.constant 0 : i32
    return %c0_i32, %c0_i32_0 : i32, i32
  }
  func.func @transform_8(%arg0: i32) -> (i32, i32) {
    %c0_i32 = arith.constant 0 : i32
    %c0_i32_0 = arith.constant 0 : i32
    %c0_i32_1 = arith.constant 0 : i32
    return %c0_i32, %c0_i32_0 : i32, i32
  }
  func.func @transform_9(%arg0: i32) -> (i32, i32) {
    %c0_i32 = arith.constant 0 : i32
    %c0_i32_0 = arith.constant 0 : i32
    return %arg0, %c0_i32 : i32, i32
  }
}

</mosaic_0001>

<bundles_post_ra>
// kernel: post_processor.1
= control target key start
LH: loop header
LB: loop body
LE: loop exit
PB: predicated region body
PF: predicated region fallthrough
CT: control target
= control target key end

     0   :  { %16 = vsyncpa [#allocation5], 0  ;;  %s995_s0 = inlined_call_operand.hbm [shape: f32[8,32], index: 0, kind: input, shape index: {}]   ;;  %s996_s1 = inlined_call_operand.hbm [shape: bf16[32,256], index: 1, kind: input, shape index: {}]   ;;  %s997_s2 = inlined_call_operand.vmem [shape: f32[1,256], index: 2, kind: input, shape index: {}]   ;;  %s998_s3 = inlined_call_operand.<no memory space> [shape: f32[1,1], index: 3, kind: input, shape index: {}]   ;;  %s999_s4 = inlined_call_operand.hbm [shape: bf16[256,256], index: 4, kind: input, shape index: {}]   ;;  %s1000_s5 = inlined_call_operand.vmem [shape: f32[1,256], index: 5, kind: input, shape index: {}]   ;;  %s1001_s6 = inlined_call_operand.<no memory space> [shape: f32[1,1], index: 6, kind: input, shape index: {}]   ;;  %s1002_s7 = inlined_call_operand.hbm [shape: bf16[256,128], index: 7, kind: input, shape index: {}]   ;;  %s1003_s8 = inlined_call_operand.vmem [shape: f32[1,128], index: 8, kind: input, shape index: {}]   ;;  %s1004_s9 = inlined_call_operand.hbm [shape: f32[8,128], index: 9, kind: output, shape index: {}]  }
   0x1   :  { %17 = vsyncpa [#allocation8], 0 }
   0x2   :  { %18 = vsyncpa [#allocation11], 0 }
   0x3   :  { %19 = vsyncpa [#allocation6], 0  ;;  %s905_s30 = smov [#allocation7]  }
   0x4   :  { %s35_s10 = sshll.u32 %s905_s30, 4  ;;  %s36_s10 = int_to_ptr.vmem [resolvable:$true] %s35_s10 }
   0x5   :  { %s805_s11 = scalar_lea.vmem %s36_s10, 512  ;;  %p810_p1 = scmp.lt.s32.totalorder %s36_s10, %s36_s10 }
   0x6   :  { %p806_p0 = scmp.ne.s32.totalorder %s36_s10, %s805_s11  ;;  %p811_p2 = scmp.lt.s32.totalorder %s805_s11, %s805_s11 }
   0x8   :  { %p812_p3 = por %p811_p2, %p810_p1 }
   0xa   :  { %p813_p4 = pnand %p812_p3, %p806_p0 }
   0xc   :  { %816 = shalt.err (!%p813_p4)
}
   0xd   :  { %s906_s12 = smov 128   ;;  %s907_s13 = smov 8  }
   0xe   :  { %41 = dma.hbm_to_vmem [thread:$0]  %s996_s1, 512, %s36_s10, [#allocation8], %s906_s12, %s906_s12, %s907_s13  }
   0xf   :  { %s908_s16 = smov [#allocation4]   ;;  %s909_s18 = smov [#allocation9]  }
  0x10   :  { %s26_s17 = sshll.u32 %s908_s16, 4  ;;  %s51_s19 = sshll.u32 %s909_s18, 4  ;;  %s27_s17 = int_to_ptr.vmem [resolvable:$true] %s26_s17  ;;  %s52_s19 = int_to_ptr.vmem [resolvable:$true] %s51_s19 }
  0x11   :  { %s825_s20 = scalar_lea.vmem %s27_s17, 128  ;;  %p830_p6 = scmp.lt.s32.totalorder %s27_s17, %s27_s17 }
  0x12   :  { %p826_p5 = scmp.ne.s32.totalorder %s27_s17, %s825_s20  ;;  %p831_p7 = scmp.lt.s32.totalorder %s825_s20, %s825_s20 }
  0x14   :  { %p832_p8 = por %p831_p7, %p830_p6 }
  0x16   :  { %p833_p9 = pnand %p832_p8, %p826_p5 }
  0x18   :  { %836 = shalt.err (!%p833_p9)
}
  0x19   :  { %29 = dma.hbm_to_vmem [thread:$0]  %s995_s0, 128, %s27_s17, [#allocation5]  }
  0x1a   :  { %s845_s23 = scalar_lea.vmem %s52_s19, 4096  ;;  %p850_p11 = scmp.lt.s32.totalorder %s52_s19, %s52_s19 }
  0x1b   :  { %p846_p10 = scmp.ne.s32.totalorder %s52_s19, %s845_s23  ;;  %p851_p12 = scmp.lt.s32.totalorder %s845_s23, %s845_s23 }
  0x1d   :  { %p852_p13 = por %p851_p12, %p850_p11 }
  0x1f   :  { %p853_p0 = pnand %p852_p13, %p846_p10 }
  0x21   :  { %856 = shalt.err (!%p853_p0)
}
  0x22   :  { %57 = dma.hbm_to_vmem [thread:$0]  %s999_s4, 4096, %s52_s19, [#allocation8], %s906_s12, %s906_s12, %s907_s13  }
  0x23   :  { %s910_s25 = smov [#allocation10]  }
  0x24   :  { %s67_s26 = sshll.u32 %s910_s25, 4  ;;  %s68_s26 = int_to_ptr.vmem [resolvable:$true] %s67_s26 }
  0x25   :  { %s865_s27 = scalar_lea.vmem %s68_s26, 2048  ;;  %p870_p2 = scmp.lt.s32.totalorder %s68_s26, %s68_s26 }
  0x26   :  { %p866_p1 = scmp.ne.s32.totalorder %s68_s26, %s865_s27  ;;  %p871_p3 = scmp.lt.s32.totalorder %s865_s27, %s865_s27 }
  0x28   :  { %p872_p4 = por %p871_p3, %p870_p2 }
  0x2a   :  { %p873_p5 = pnand %p872_p4, %p866_p1 }
  0x2c   :  { %876 = shalt.err (!%p873_p5)
}
  0x2d   :  { %s911_s0 = smov 64   ;;  %s912_s28 = smov 4  }
  0x2e   :  { %73 = dma.hbm_to_vmem [thread:$0]  %s1002_s7, 2048, %s68_s26, [#allocation11], %s911_s0, %s911_s0, %s912_s28  }
  0x2f   :  { %897 = dma.done.wait [#allocation5], 128  }
  0x30   :  { %898 = vsyncadd [#allocation5], 4294967168 }
  0x31   :  { %899 = dma.done.wait [#allocation8], 4608  }
  0x32   :  { %900 = vsyncadd [#allocation8], 4294962688 }
  0x33   :  { %901 = dma.done.wait [#allocation11], 2048  }
  0x34   :  { %902 = vsyncadd [#allocation11], 4294965248  ;;  %v913_v0 = vmov 0   ;;  %v723_v1 = vld [vmem:[#allocation7 + $0x14] ss:$8 sps:$4 sm:$0xff]   ;;  %vm129_vm0 = vcmask 261120   ;;  %v99_v50 = vlaneseq  ;;  %v176_v58 = vstv %s998_s3 }
  0x35   :  { %165 = vmatprep.mubr.bf16.mxu0 %v913_v0  ;;  %v725_v2 = vld [vmem:[#allocation7 + $0x10] ss:$8 sps:$4 sm:$0xff]   ;;  %145 = vmatprep.subr.bf16.mxu0 %v723_v1  ;;  %v726_v3 = vld [vmem:[#allocation7 + $0x4] ss:$8 sps:$4 sm:$0xff]   ;;  %v728_v4 = vld [vmem:[#allocation7] ss:$8 sps:$4 sm:$0xff]  }
  0x36   :  { %v89_v5 = vld [vmem:[#allocation4] sm:$0xff]  ;;  %146 = vmatpush1.bf16.msra.mxu0 %v725_v2  ;;  %v732_v8 = vld [vmem:[#allocation9 + $0x64] ss:$8 sps:$4 sm:$0xff]   ;;  %v734_v10 = vld [vmem:[#allocation9 + $0x60] ss:$8 sps:$4 sm:$0xff]   ;;  %v100_v51 = vshrl.u32 %v99_v50, 7 }
  0x37   :  { %v729_v6 = vld [vmem:[#allocation9 + $0x74] ss:$8 sps:$4 sm:$0xff]   ;;  %147 = vmatprep.subr.bf16.mxu0 %v726_v3  ;;  %v731_v7 = vld [vmem:[#allocation9 + $0x70] ss:$8 sps:$4 sm:$0xff]   ;;  %v90_v9 = vpack.c.bf16 %v89_v5, %v89_v5  ;;  %v738_v13 = vld [vmem:[#allocation9 + $0x44] ss:$8 sps:$4 sm:$0xff]  }
  0x38   :  { %387 = vmatprep.subr.bf16.mxu1 %v729_v6  ;;  %v735_v11 = vld [vmem:[#allocation9 + $0x54] ss:$8 sps:$4 sm:$0xff]   ;;  %v737_v12 = vld [vmem:[#allocation9 + $0x50] ss:$8 sps:$4 sm:$0xff]   ;;  %v740_v14 = vld [vmem:[#allocation9 + $0x40] ss:$8 sps:$4 sm:$0xff]  }
  0x39   :  { %388 = vmatpush1.bf16.msra.mxu1 %v731_v7  ;;  %v741_v15 = vld [vmem:[#allocation9 + $0x34] ss:$8 sps:$4 sm:$0xff]   ;;  %v743_v16 = vld [vmem:[#allocation9 + $0x30] ss:$8 sps:$4 sm:$0xff]   ;;  %v744_v17 = vld [vmem:[#allocation9 + $0x24] ss:$8 sps:$4 sm:$0xff]  }
  0x3a   :  { %148 = vmatpush1.bf16.msra.mxu0 %v728_v4  ;;  %389 = vmatprep.subr.bf16.mxu1 %v732_v8  ;;  %v746_v18 = vld [vmem:[#allocation9 + $0x20] ss:$8 sps:$4 sm:$0xff]   ;;  %v747_v19 = vld [vmem:[#allocation9 + $0x14] ss:$8 sps:$4 sm:$0xff]   ;;  %v749_v20 = vld [vmem:[#allocation9 + $0x10] ss:$8 sps:$4 sm:$0xff]  }
  0x3b   :  { %v750_v21 = vld [vmem:[#allocation9 + $0x4] ss:$8 sps:$4 sm:$0xff]   ;;  %v752_v22 = vld [vmem:[#allocation9] ss:$8 sps:$4 sm:$0xff]   ;;  %v753_v23 = vld [vmem:[#allocation9 + $0xf4] ss:$8 sps:$4 sm:$0xff]  }
  0x3c   :  { %v755_v24 = vld [vmem:[#allocation9 + $0xf0] ss:$8 sps:$4 sm:$0xff]   ;;  %v756_v25 = vld [vmem:[#allocation9 + $0xe4] ss:$8 sps:$4 sm:$0xff]   ;;  %v758_v26 = vld [vmem:[#allocation9 + $0xe0] ss:$8 sps:$4 sm:$0xff]  }
  0x3d   :  { %640 = vmatmul.mubr.msk.bf16.vlgmr.msra.gmra.mxu0 %vm129_vm0, %v90_v9  ;;  %390 = vmatpush1.bf16.msra.mxu1 %v734_v10  ;;  %v759_v27 = vld [vmem:[#allocation9 + $0xd4] ss:$8 sps:$4 sm:$0xff]   ;;  %v761_v28 = vld [vmem:[#allocation9 + $0xd0] ss:$8 sps:$4 sm:$0xff]   ;;  %v762_v29 = vld [vmem:[#allocation9 + $0xc4] ss:$8 sps:$4 sm:$0xff]  }
  0x3e   :  { %391 = vmatprep.subr.bf16.mxu1 %v735_v11  ;;  %v764_v30 = vld [vmem:[#allocation9 + $0xc0] ss:$8 sps:$4 sm:$0xff]   ;;  %v765_v31 = vld [vmem:[#allocation9 + $0xb4] ss:$8 sps:$4 sm:$0xff]   ;;  %v767_v32 = vld [vmem:[#allocation9 + $0xb0] ss:$8 sps:$4 sm:$0xff]  }
  0x3f   :  { %v768_v33 = vld [vmem:[#allocation9 + $0xa4] ss:$8 sps:$4 sm:$0xff]   ;;  %v770_v34 = vld [vmem:[#allocation9 + $0xa0] ss:$8 sps:$4 sm:$0xff]   ;;  %v771_v35 = vld [vmem:[#allocation9 + $0x94] ss:$8 sps:$4 sm:$0xff]  }
  0x40   :  { %v773_v36 = vld [vmem:[#allocation9 + $0x90] ss:$8 sps:$4 sm:$0xff]   ;;  %v774_v37 = vld [vmem:[#allocation9 + $0x84] ss:$8 sps:$4 sm:$0xff]   ;;  %v776_v38 = vld [vmem:[#allocation9 + $0x80] ss:$8 sps:$4 sm:$0xff]  }
  0x41   :  { %392 = vmatpush1.bf16.msra.mxu1 %v737_v12  ;;  %v777_v39 = vld [vmem:[#allocation10 + $0x78] sm:$0xff]   ;;  %v779_v41 = vld [vmem:[#allocation10 + $0x70] sm:$0xff]   ;;  %v781_v43 = vld [vmem:[#allocation10 + $0x68] sm:$0xff]   ;;  %v101_v52 = vsub.s32 0, %v100_v51  ;;  %v105_v54 = vsub.s32 1, %v100_v51 }
  0x42   :  { %393 = vmatprep.subr.bf16.mxu1 %v738_v13  ;;  %v778_v40 = vld [vmem:[#allocation10 + $0x38] sm:$0xff]   ;;  %691 = vmatprep.subr.bf16.mxu0 %v777_v39  ;;  %v780_v42 = vld [vmem:[#allocation10 + $0x30] sm:$0xff]   ;;  %v782_v44 = vld [vmem:[#allocation10 + $0x28] sm:$0xff]  }
  0x43   :  { %692 = vmatpush3.bf16.msra.mxu0 %v778_v40  ;;  %v783_v45 = vld [vmem:[#allocation10 + $0x60] sm:$0xff]   ;;  %v785_v47 = vld [vmem:[#allocation10 + $0x58] sm:$0xff]   ;;  %v787_v49 = vld [vmem:[#allocation10 + $0x50] sm:$0xff]  }
  0x44   :  { %693 = vmatprep.subr.bf16.mxu0 %v779_v41  ;;  %v784_v46 = vld [vmem:[#allocation10 + $0x20] sm:$0xff]   ;;  %v786_v48 = vld [vmem:[#allocation10 + $0x18] sm:$0xff]   ;;  %v788_v6 = vld [vmem:[#allocation10 + $0x10] sm:$0xff]  }
  0x45   :  { %394 = vmatpush1.bf16.msra.mxu1 %v740_v14  ;;  %v97_v53 = vld [vmem:[%s997_s2] sm:$0x3]  ;;  %v789_v7 = vld [vmem:[#allocation10 + $0x48] sm:$0xff]   ;;  %v791_v9 = vld [vmem:[#allocation10 + $0x40] sm:$0xff]  }
  0x46   :  { %395 = vmatprep.subr.bf16.mxu1 %v741_v15  ;;  %v102_v55 = vrot.slane %v97_v53, %v101_v52  ;;  %v106_v56 = vrot.slane %v97_v53, %v105_v54  ;;  %v790_v8 = vld [vmem:[#allocation10 + $0x8] sm:$0xff]   ;;  %v792_v10 = vld [vmem:[#allocation10] sm:$0xff]   ;;  %v215_v11 = vld [vmem:[%s1000_s5] sm:$0x3]  ;;  %v430_v15 = vstv %s1001_s6  ;;  %s914_s6 = smov [#allocation12]  }
  0x47   :  { %694 = vmatpush3.bf16.msra.mxu0 %v780_v42  ;;  %v220_v12 = vrot.slane %v215_v11, %v101_v52  ;;  %v224_v13 = vrot.slane %v215_v11, %v105_v54  ;;  %s625_s15 = sshll.u32 %s914_s6, 4  ;;  %s626_s15 = int_to_ptr.vmem [resolvable:$true] %s625_s15 }
  0x48   :  { %695 = vmatprep.subr.bf16.mxu0 %v781_v43  ;;  %s877_s16 = scalar_lea.vmem %s626_s15, 128  ;;  %p882_p7 = scmp.lt.s32.totalorder %s626_s15, %s626_s15 }
  0x49   :  { %396 = vmatpush1.bf16.msra.mxu1 %v743_v16  ;;  %p878_p6 = scmp.ne.s32.totalorder %s626_s15, %s877_s16  ;;  %p883_p8 = scmp.lt.s32.totalorder %s877_s16, %s877_s16 }
  0x4a   :  { %397 = vmatprep.subr.bf16.mxu1 %v744_v17 }
  0x4b   :  { %696 = vmatpush3.bf16.msra.mxu0 %v782_v44  ;;  %p884_p9 = por %p883_p8, %p882_p7 }
  0x4c   :  { %697 = vmatprep.subr.bf16.mxu0 %v783_v45 }
  0x4d   :  { %398 = vmatpush1.bf16.msra.mxu1 %v746_v18  ;;  %p885_p10 = pnand %p884_p9, %p878_p6 }
  0x4e   :  { %399 = vmatprep.subr.bf16.mxu1 %v747_v19 }
  0x4f   :  { %698 = vmatpush3.bf16.msra.mxu0 %v784_v46 }
  0x50   :  { %699 = vmatprep.subr.bf16.mxu0 %v785_v47 }
  0x51   :  { %400 = vmatpush1.bf16.msra.mxu1 %v749_v20 }
  0x52   :  { %401 = vmatprep.subr.bf16.mxu1 %v750_v21 }
  0x53   :  { %700 = vmatpush3.bf16.msra.mxu0 %v786_v48 }
  0x54   :  { %701 = vmatprep.subr.bf16.mxu0 %v787_v49 }
  0x55   :  { %402 = vmatpush1.bf16.msra.mxu1 %v752_v22 }
  0x56   :  { %403 = vmatprep.subr.bf16.mxu1 %v753_v23 }
  0x57   :  { %702 = vmatpush3.bf16.msra.mxu0 %v788_v6 }
  0x58   :  { %703 = vmatprep.subr.bf16.mxu0 %v789_v7 }
  0x59   :  { %404 = vmatpush2.bf16.msra.mxu1 %v755_v24 }
  0x5a   :  { %405 = vmatprep.subr.bf16.mxu1 %v756_v25 }
  0x5b   :  { %704 = vmatpush3.bf16.msra.mxu0 %v790_v8 }
  0x5c   :  { %705 = vmatprep.subr.bf16.mxu0 %v791_v9 }
  0x5d   :  { %406 = vmatpush2.bf16.msra.mxu1 %v758_v26 }
  0x5e   :  { %407 = vmatprep.subr.bf16.mxu1 %v759_v27 }
  0x5f   :  { %706 = vmatpush3.bf16.msra.mxu0 %v792_v10 }
  0x61   :  { %408 = vmatpush2.bf16.msra.mxu1 %v761_v28  ;;  %v673_v28 = vld [vmem:[%s1003_s8] ss:$0 sm:$0xff] }
  0x62   :  { %409 = vmatprep.subr.bf16.mxu1 %v762_v29 }
  0x65   :  { %410 = vmatpush2.bf16.msra.mxu1 %v764_v30 }
  0x66   :  { %411 = vmatprep.subr.bf16.mxu1 %v765_v31 }
  0x69   :  { %412 = vmatpush2.bf16.msra.mxu1 %v767_v32 }
  0x6a   :  { %413 = vmatprep.subr.bf16.mxu1 %v768_v33 }
  0x6d   :  { %414 = vmatpush2.bf16.msra.mxu1 %v770_v34 }
  0x6e   :  { %415 = vmatprep.subr.bf16.mxu1 %v771_v35 }
  0x71   :  { %416 = vmatpush2.bf16.msra.mxu1 %v773_v36 }
  0x72   :  { %417 = vmatprep.subr.bf16.mxu1 %v774_v37 }
  0x75   :  { %418 = vmatpush2.bf16.msra.mxu1 %v776_v38 }
  0xfd   :  { %v167_v57 = vpop.f32.mrf.mxu0 }
  0xfe   :  { %v168_v59 = vadd.f32 %v167_v57, %v102_v55 }
  0xff   :  { %v169_v60 = vpop.f32.mrf.mxu0 }
 0x100   :  { %vm174_vm1 = vcmp.gt.f32.partialorder %v168_v59, 0.0  ;;  %v177_v61 = vmul.f32 %v176_v58, %v168_v59  ;;  %v170_v62 = vadd.f32 %v169_v60, %v106_v56 }
 0x101   :  { %v171_v63 = vpop.f32.mrf.mxu0 }
 0x102   :  { %vm175_vm2 = vcmp.gt.f32.partialorder %v170_v62, 0.0  ;;  %v178_v0 = vmul.f32 %v176_v58, %v170_v62  ;;  %v179_v2 = vsel %vm174_vm1, %v168_v59, %v177_v61 }
 0x103   :  { %v172_v1 = vpop.f32.mrf.mxu0  ;;  %v181_v5 = vpack.c.bf16 %v179_v2, %v179_v2 }
 0x104   :  { %v180_v3 = vsel %vm175_vm2, %v170_v62, %v178_v0 }
 0x105   :  { %v182_v4 = vpack.c.bf16 %v180_v3, %v180_v3 }
 0x107   :  { %419 = vmatprep.mubr.bf16.mxu1 %v182_v4 }
 0x108   :  { %420 = vmatmul.mubr.bf16.vlgmr.msra.gmra.mxu1 %v181_v5 }
 0x1c8   :  { %v421_v14 = vpop.f32.mrf.mxu1 }
 0x1c9   :  { %v422_v16 = vadd.f32 %v421_v14, %v220_v12 }
 0x1ca   :  { %v423_v17 = vpop.f32.mrf.mxu1 }
 0x1cb   :  { %vm428_vm3 = vcmp.gt.f32.partialorder %v422_v16, 0.0  ;;  %v431_v18 = vmul.f32 %v430_v15, %v422_v16  ;;  %v424_v19 = vadd.f32 %v423_v17, %v224_v13 }
 0x1cc   :  { %v425_v20 = vpop.f32.mrf.mxu1 }
 0x1cd   :  { %vm429_vm4 = vcmp.gt.f32.partialorder %v424_v19, 0.0  ;;  %v432_v21 = vmul.f32 %v430_v15, %v424_v19  ;;  %v433_v22 = vsel %vm428_vm3, %v422_v16, %v431_v18 }
 0x1ce   :  { %v426_v23 = vpop.f32.mrf.mxu1  ;;  %v435_v26 = vpack.c.bf16 %v433_v22, %v433_v22 }
 0x1cf   :  { %v434_v24 = vsel %vm429_vm4, %v424_v19, %v432_v21 }
 0x1d0   :  { %v436_v25 = vpack.c.bf16 %v434_v24, %v434_v24 }
 0x1d2   :  { %604 = vmatprep.mubr.bf16.mxu0 %v436_v25 }
 0x1d3   :  { %605 = vmatmul.mubr.bf16.vlgmr.msra.gmra.mxu0 %v435_v26 }
 0x293   :  { %v707_v27 = vpop.f32.mrf.mxu0 }
 0x295   :  { %v708_v29 = vpop.f32.mrf.mxu0 }
 0x296   :  { %v709_v30 = vadd.f32 %v708_v29, %v707_v27 }
 0x297   :  { %v710_v31 = vpop.f32.mrf.mxu0 }
 0x298   :  { %v607_v32 = vadd.f32 %v709_v30, %v673_v28 }
 0x299   :  { %v711_v33 = vpop.f32.mrf.mxu0 }
 0x29a   :  { %v690_v34 = vmul.f32 -1.442695, %v607_v32 }
 0x29c   :  { %793 = vpow2.f32 %v690_v34 }
 0x2a9   :  { %v794_v35 = vpop.eup %793 }
 0x2aa   :  { %v615_v36 = vadd.f32 1.0, %v794_v35 }
 0x2ac   :  { %795 = vrcp.f32 %v615_v36 }
 0x2b9   :  { %v796_v37 = vpop.eup %795 }
 0x2ba   :  { %618 = vst [vmem:[#allocation12] sm:$0xff] %v796_v37 }
 0x2bb   :  { %888 = shalt.err (!%p885_p10)
}
 0x2bc   :  { %628 = dma.vmem_to_hbm [thread:$0]  %s626_s15, 128, %s1004_s9, [#allocation6]  }
 0x2bd   :  { %903 = dma.done.wait [#allocation6], 128  }
 0x2be   :  { %904 = vsyncadd [#allocation6], 4294967168 }
 0x2bf   :  { %632 = vsyncpa [#allocation5], 1 }
 0x2c0   :  { %633 = vsyncpa [#allocation8], 1 }
 0x2c1   :  { %634 = vsyncpa [#allocation11], 1 }
 0x2c2   :  { %635 = vsyncpa [#allocation6], 1 }

</bundles_post_ra>
